<compile_context>
chip_gen: v7x
topology: tpu7x:2x2x1
jax: 0.10.0
libtpu: 0.0.40
codegen_flags: <defaults>
</compile_context>

<pallas_src>
import functools

import jax
import jax.numpy as jnp
from jax import lax
from jax.experimental import pallas as pl
from jax.experimental.pallas import tpu as pltpu


def memory_bank_kernel(x_ref, mem_ref, gamma_ref, beta_ref,
                       read_ref, newmem_ref, *, matmul_dtype):
    n, _ = x_ref.shape
    m, h = mem_ref.shape

    # MXU operands; no dead f32 round-trip of x.
    xm = x_ref[...].astype(matmul_dtype)               # (N, H)
    mem = mem_ref[...].astype(jnp.float32)             # (M, H) f32 for update/LN
    mm = mem.astype(matmul_dtype)                       # (M, H) MXU operand

    # scores = x @ memory.T -> (N, M): contract the hidden dims directly so no
    # transposed copy of memory is materialized.
    scores = lax.dot_general(
        xm, mm, dimension_numbers=(((1,), (1,)), ((), ())),
        preferred_element_type=jnp.float32)             # (N, M)

    # --- softmax over memory slots, normalization folded past the matmul ---
    s_max = jnp.max(scores, axis=-1, keepdims=True)     # (N, 1)  lane-max
    e = jnp.exp(scores - s_max)                         # (N, M)  EUP
    e_m = e.astype(matmul_dtype)

    # Unnormalized read and the softmax denominator, both on the MXU.  The
    # row-sum as e @ ones(M,1) replaces the (N,M) cross-lane XLU reduction.
    unnorm = jnp.dot(e_m, mm, preferred_element_type=jnp.float32)        # (N, H)
    denom = jnp.dot(e_m, jnp.ones((m, 1), matmul_dtype),
                    preferred_element_type=jnp.float32)                  # (N, 1)
    # Exact reciprocal (approx=False) for parity with the f32 reference.
    read = unnorm * pl.reciprocal(denom, approx=False)                   # (N, H)
    read_ref[...] = read.astype(read_ref.dtype)

    # --- memory update ---
    # update_gate = mean over (batch, seq) of sigmoid(scores) -> (M, 1); done
    # as a transposed MXU contraction over N, removing the (1,M)->(M,1) XLU
    # relayout and the sublane mean.
    inv_n = jnp.full((n, 1), 1.0 / n, matmul_dtype)
    gate = lax.dot_general(
        jax.nn.sigmoid(scores).astype(matmul_dtype), inv_n,
        dimension_numbers=(((0,), (0,)), ((), ())),
        preferred_element_type=jnp.float32)              # (M, 1)

    # read_avg over (batch, seq) -> (1, H), also on the (otherwise idle) MXU
    # instead of a sublane (XLU) mean.
    read_avg = jnp.dot(jnp.full((1, n), 1.0 / n, matmul_dtype),
                       read.astype(matmul_dtype),
                       preferred_element_type=jnp.float32)               # (1, H)

    new_mem = mem * (1.0 - gate) + read_avg * gate                       # (M, H)

    # LayerNorm over hidden dim (PyTorch defaults: eps=1e-5, biased variance).
    mu = jnp.mean(new_mem, axis=-1, keepdims=True)
    var = jnp.mean((new_mem - mu) ** 2, axis=-1, keepdims=True)
    normed = (new_mem - mu) * lax.rsqrt(var + 1e-5)
    newmem_ref[...] = (normed * gamma_ref[...] + beta_ref[...]).astype(newmem_ref.dtype)


def neural_memory_bank(x, memory, ln_gamma, ln_beta, *, matmul_dtype=jnp.float32):
    """x: (B, S, H); memory: (M, H).

    Returns (read (B,S,H), new_memory (M,H) = LayerNorm'd updated memory).
    new_memory is aliased onto the `memory` input buffer (mirrors the PyTorch
    in-place self.memory.data write).

    matmul_dtype: keep f32 for parity with the PyTorch module; pass
    jnp.bfloat16 on v6e/v7x once B*S scales (MXU is bf16-native there;
    accumulation and all softmax/sigmoid/LayerNorm math stay f32)."""
    B, S, H = x.shape
    M = memory.shape[0]
    N = B * S
    # TODO(synk): H=32 fills only 32/128 lanes of every vreg and forces masked
    # stores; if the surrounding model allows folding heads/banks into the
    # hidden axis, present a last dim that is a multiple of 128 here.
    x2 = x.reshape(N, H)

    x_isz = jnp.dtype(x.dtype).itemsize
    m_isz = jnp.dtype(memory.dtype).itemsize
    cost = pl.CostEstimate(
        # two (N,M,H) matmuls + three small MXU reductions
        flops=4 * N * M * H + 4 * N * M + 2 * N * H,
        transcendentals=2 * N * M + M + N,           # exp + sigmoid, rsqrt, recip
        # Only HBM-touched arrays (scores stay in VMEM); real dtype sizes.
        bytes_accessed=2 * N * H * x_isz + 2 * M * H * m_isz + 2 * H * 4,
    )

    read2, new_mem = pl.pallas_call(
        functools.partial(memory_bank_kernel, matmul_dtype=matmul_dtype),
        out_shape=(jax.ShapeDtypeStruct((N, H), x.dtype),
                   jax.ShapeDtypeStruct((M, H), memory.dtype)),
        # Everything fits comfortably in VMEM at these sizes -> single block,
        # no grid (per-grid-step + launch overhead would dominate).
        # TODO(synk): if B*S grows, tile N with a "parallel" grid axis (shards
        # across v7x's 2 TensorCores), budget tiles against v7x's 64 MiB
        # physical / 32 MiB default-scoped VMEM (raise vmem_limit_bytes
        # explicitly; ~half that tile on v5e's 16 MiB scoped default), keep
        # gate / read_avg as VMEM scratch partial sums initialized under
        # pl.when(i == 0), and do the (M,H) update + LayerNorm once under
        # pl.when(i == last).
        in_specs=[pl.BlockSpec(memory_space=pltpu.MemorySpace.VMEM)] * 4,
        out_specs=(pl.BlockSpec(memory_space=pltpu.MemorySpace.VMEM),
                   pl.BlockSpec(memory_space=pltpu.MemorySpace.VMEM)),
        # Mirror the in-place self.memory.data update: memory (input 1) and
        # new_memory (output 1) share one HBM buffer.
        input_output_aliases={1: 1},
        cost_estimate=cost,
    )(x2, memory, ln_gamma.reshape(1, H), ln_beta.reshape(1, H))

    return read2.reshape(B, S, H), new_mem


def neural_memory_bank_ref(x, memory, ln_gamma, ln_beta):
    """Pure-JAX reference mirroring the PyTorch forward."""
    scores = jnp.einsum("bsh,mh->bsm", x, memory)
    weights = jax.nn.softmax(scores, axis=-1)
    read = jnp.einsum("bsm,mh->bsh", weights, memory)
    gate = jnp.mean(jax.nn.sigmoid(scores), axis=(0, 1))        # (M,)
    read_avg = jnp.mean(read, axis=(0, 1))                       # (H,)
    new_mem = memory * (1 - gate[:, None]) + read_avg[None, :] * gate[:, None]
    mu = jnp.mean(new_mem, axis=-1, keepdims=True)
    var = jnp.mean((new_mem - mu) ** 2, axis=-1, keepdims=True)
    new_mem = (new_mem - mu) / jnp.sqrt(var + 1e-5) * ln_gamma + ln_beta
    return read, new_mem


if __name__ == "__main__":
    key = jax.random.PRNGKey(0)
    B, S, H, M = 2, 8, 32, 128   # batch=2, seq=8, hidden=32, memory_size=128

    k_x, k_mem, k_sel = jax.random.split(key, 3)
    x = jax.random.normal(k_x, (B, S, H), dtype=jnp.float32)

    # Parameters (randn-like, as in nn.Parameter(torch.randn(...))).
    memory = jax.random.normal(k_mem, (M, H), dtype=jnp.float32)
    ln_gamma = jnp.ones((H,), jnp.float32)   # LayerNorm weight (init)
    ln_beta = jnp.zeros((H,), jnp.float32)   # LayerNorm bias (init)

    # self.selector (Linear(H,H) + Softmax) is defined in __init__ but never
    # used in forward(); initialized here for completeness only.
    sel_w = jax.random.normal(k_sel, (H, H), jnp.float32) / jnp.sqrt(H)
    sel_b = jnp.zeros((H,), jnp.float32)

    read, new_memory = jax.jit(neural_memory_bank)(x, memory, ln_gamma, ln_beta)
    jax.block_until_ready((read, new_memory))

    assert read.shape == (B, S, H)
    assert new_memory.shape == (M, H)

    # Pure-JAX reference check (loose tolerance: MXU f32 path vs XLA fusion).
    read_ref, new_mem_ref = jax.jit(neural_memory_bank_ref)(x, memory, ln_gamma, ln_beta)
    assert float(jnp.max(jnp.abs(read - read_ref))) < 5e-2
    assert float(jnp.max(jnp.abs(new_memory - new_mem_ref))) < 5e-2

    print("KERNEL_OK")
</pallas_src>

<mosaic_0001>
module attributes {stable_mosaic.version = 11 : i64} {
  func.func @memory_bank_kernel(%arg0: memref<16x32xf32, #tpu.memory_space<vmem>>, %arg1: memref<128x32xf32, #tpu.memory_space<vmem>>, %arg2: memref<1x32xf32, #tpu.memory_space<vmem>>, %arg3: memref<1x32xf32, #tpu.memory_space<vmem>>, %arg4: memref<16x32xf32, #tpu.memory_space<vmem>>, %arg5: memref<128x32xf32, #tpu.memory_space<vmem>>) attributes {dimension_semantics = [], scalar_prefetch = 0 : i64, scratch_operands = 0 : i64, tpu.core_type = #tpu.core_type<tc>} {
    %c0 = arith.constant 0 : index
    %c0_0 = arith.constant 0 : index
    %0 = vector.load %arg0[%c0, %c0_0] : memref<16x32xf32, #tpu.memory_space<vmem>>, vector<16x32xf32>
    %c0_1 = arith.constant 0 : index
    %c0_2 = arith.constant 0 : index
    %1 = vector.load %arg1[%c0_1, %c0_2] : memref<128x32xf32, #tpu.memory_space<vmem>>, vector<128x32xf32>
    %cst = arith.constant dense<0.000000e+00> : vector<16x128xf32>
    %2 = tpu.matmul %0, %1, %cst {dimension_numbers = #tpu.dot_dimension_numbers<[1], [1], [0], [0], [0, 0, 1, 0], [], []>} : vector<16x32xf32>, vector<128x32xf32>, vector<16x128xf32> -> vector<16x128xf32>
    %cst_3 = arith.constant dense<0xFF800000> : vector<16xf32>
    %3 = vector.multi_reduction <maximumf>, %2, %cst_3 [1] : vector<16x128xf32> to vector<16xf32>
    %4 = vector.shape_cast %3 : vector<16xf32> to vector<16x1xf32>
    %5 = vector.broadcast %4 : vector<16x1xf32> to vector<16x128xf32>
    %6 = arith.subf %2, %5 : vector<16x128xf32>
    %7 = math.exp %6 : vector<16x128xf32>
    %cst_4 = arith.constant dense<0.000000e+00> : vector<16x32xf32>
    %8 = tpu.matmul %7, %1, %cst_4 {dimension_numbers = #tpu.dot_dimension_numbers<[1], [0], [0], [1], [0, 0, 1, 1], [], []>} : vector<16x128xf32>, vector<128x32xf32>, vector<16x32xf32> -> vector<16x32xf32>
    %cst_5 = arith.constant 1.000000e+00 : f32
    %9 = vector.broadcast %cst_5 : f32 to vector<128x1xf32>
    %cst_6 = arith.constant dense<0.000000e+00> : vector<16x1xf32>
    %10 = tpu.matmul %7, %9, %cst_6 {dimension_numbers = #tpu.dot_dimension_numbers<[1], [0], [0], [1], [0, 0, 1, 1], [], []>} : vector<16x128xf32>, vector<128x1xf32>, vector<16x1xf32> -> vector<16x1xf32>
    %11 = tpu.reciprocal %10 : vector<16x1xf32> -> vector<16x1xf32>
    %12 = vector.broadcast %11 : vector<16x1xf32> to vector<16x32xf32>
    %13 = arith.mulf %8, %12 : vector<16x32xf32>
    %c0_7 = arith.constant 0 : index
    %c0_8 = arith.constant 0 : index
    %14 = vector.load %arg4[%c0_7, %c0_8] : memref<16x32xf32, #tpu.memory_space<vmem>>, vector<16x32xf32>
    tpu.vector_store %arg4[%c0_7, %c0_8], %13 {strides = array<i32>} : memref<16x32xf32, #tpu.memory_space<vmem>>, vector<16x32xf32>,
    %cst_9 = arith.constant 6.250000e-02 : f32
    %15 = vector.broadcast %cst_9 : f32 to vector<16x1xf32>
    %16 = arith.negf %2 : vector<16x128xf32>
    %17 = math.exp %16 : vector<16x128xf32>
    %cst_10 = arith.constant 1.000000e+00 : f32
    %18 = vector.broadcast %cst_10 : f32 to vector<16x128xf32>
    %19 = arith.addf %18, %17 : vector<16x128xf32>
    %20 = arith.divf %18, %19 : vector<16x128xf32>
    %cst_11 = arith.constant dense<0.000000e+00> : vector<128x1xf32>
    %21 = tpu.matmul %20, %15, %cst_11 {dimension_numbers = #tpu.dot_dimension_numbers<[0], [0], [1], [1], [0, 1, 1, 1], [], []>} : vector<16x128xf32>, vector<16x1xf32>, vector<128x1xf32> -> vector<128x1xf32>
    %cst_12 = arith.constant 6.250000e-02 : f32
    %22 = vector.broadcast %cst_12 : f32 to vector<1x16xf32>
    %cst_13 = arith.constant dense<0.000000e+00> : vector<1x32xf32>
    %23 = tpu.matmul %22, %13, %cst_13 {dimension_numbers = #tpu.dot_dimension_numbers<[1], [0], [0], [1], [0, 0, 1, 1], [], []>} : vector<1x16xf32>, vector<16x32xf32>, vector<1x32xf32> -> vector<1x32xf32>
    %cst_14 = arith.constant 1.000000e+00 : f32
    %24 = vector.broadcast %cst_14 : f32 to vector<128x1xf32>
    %25 = arith.subf %24, %21 : vector<128x1xf32>
    %26 = vector.broadcast %25 : vector<128x1xf32> to vector<128x32xf32>
    %27 = arith.mulf %1, %26 : vector<128x32xf32>
    %28 = vector.broadcast %23 : vector<1x32xf32> to vector<128x32xf32>
    %29 = vector.broadcast %21 : vector<128x1xf32> to vector<128x32xf32>
    %30 = arith.mulf %28, %29 : vector<128x32xf32>
    %31 = arith.addf %27, %30 : vector<128x32xf32>
    %cst_15 = arith.constant dense<0.000000e+00> : vector<128xf32>
    %32 = vector.multi_reduction <add>, %31, %cst_15 [1] : vector<128x32xf32> to vector<128xf32>
    %33 = vector.shape_cast %32 : vector<128xf32> to vector<128x1xf32>
    %cst_16 = arith.constant 3.200000e+01 : f32
    %34 = vector.broadcast %cst_16 : f32 to vector<128x1xf32>
    %35 = arith.divf %33, %34 : vector<128x1xf32>
    %36 = vector.broadcast %35 : vector<128x1xf32> to vector<128x32xf32>
    %37 = arith.subf %31, %36 : vector<128x32xf32>
    %38 = arith.mulf %37, %37 : vector<128x32xf32>
    %cst_17 = arith.constant dense<0.000000e+00> : vector<128xf32>
    %39 = vector.multi_reduction <add>, %38, %cst_17 [1] : vector<128x32xf32> to vector<128xf32>
    %40 = vector.shape_cast %39 : vector<128xf32> to vector<128x1xf32>
    %cst_18 = arith.constant 3.200000e+01 : f32
    %41 = vector.broadcast %cst_18 : f32 to vector<128x1xf32>
    %42 = arith.divf %40, %41 : vector<128x1xf32>
    %43 = vector.broadcast %35 : vector<128x1xf32> to vector<128x32xf32>
    %44 = arith.subf %31, %43 : vector<128x32xf32>
    %cst_19 = arith.constant 9.99999974E-6 : f32
    %45 = vector.broadcast %cst_19 : f32 to vector<128x1xf32>
    %46 = arith.addf %42, %45 : vector<128x1xf32>
    %47 = math.rsqrt %46 : vector<128x1xf32>
    %48 = vector.broadcast %47 : vector<128x1xf32> to vector<128x32xf32>
    %49 = arith.mulf %44, %48 : vector<128x32xf32>
    %c0_20 = arith.constant 0 : index
    %c0_21 = arith.constant 0 : index
    %50 = vector.load %arg2[%c0_20, %c0_21] : memref<1x32xf32, #tpu.memory_space<vmem>>, vector<1x32xf32>
    %51 = vector.broadcast %50 : vector<1x32xf32> to vector<128x32xf32>
    %52 = arith.mulf %49, %51 : vector<128x32xf32>
    %c0_22 = arith.constant 0 : index
    %c0_23 = arith.constant 0 : index
    %53 = vector.load %arg3[%c0_22, %c0_23] : memref<1x32xf32, #tpu.memory_space<vmem>>, vector<1x32xf32>
    %54 = vector.broadcast %53 : vector<1x32xf32> to vector<128x32xf32>
    %55 = arith.addf %52, %54 : vector<128x32xf32>
    %c0_24 = arith.constant 0 : index
    %c0_25 = arith.constant 0 : index
    %56 = vector.load %arg5[%c0_24, %c0_25] : memref<128x32xf32, #tpu.memory_space<vmem>>, vector<128x32xf32>
    tpu.vector_store %arg5[%c0_24, %c0_25], %55 {strides = array<i32>} : memref<128x32xf32, #tpu.memory_space<vmem>>, vector<128x32xf32>,
    return
  }
}

</mosaic_0001>

<bundles_post_ra>
// kernel: neural_memory_bank.1
= control target key start
LH: loop header
LB: loop body
LE: loop exit
PB: predicated region body
PF: predicated region fallthrough
CT: control target
= control target key end

     0   :  { %vm38_vm0 = vcmask 261120   ;;  %s2180_s0 = inlined_call_operand.vmem [shape: f32[16,32], index: 0, kind: input, shape index: {}]   ;;  %s2181_s1 = inlined_call_operand.vmem [shape: f32[128,32], index: 1, kind: input, shape index: {}, may-alias: {1,5}]   ;;  %s2182_s2 = inlined_call_operand.vmem [shape: f32[1,32], index: 2, kind: input, shape index: {}]   ;;  %s2183_s3 = inlined_call_operand.vmem [shape: f32[1,32], index: 3, kind: input, shape index: {}]   ;;  %s2184_s4 = inlined_call_operand.hbm [shape: f32[16,32], index: 4, kind: output, shape index: {0}]   ;;  %s2185_s5 = inlined_call_operand.vmem [shape: f32[128,32], index: 5, kind: output, shape index: {1}, may-alias: {1,5}]  }
   0x1   :  { %v1658_v0 = vld [vmem:[%s2181_s1] sm:$0xff]  ;;  %v1663_v1 = vld [vmem:[%s2181_s1 + $0x8] sm:$0xff]  ;;  %v1668_v2 = vld [vmem:[%s2181_s1 + $0x10] sm:$0xff] }
   0x2   :  { %v1428_v3 = vpack.c.bf16 %v1663_v1, %v1658_v0  ;;  %vm1674_vm1 = vmpackc.low %vm38_vm0, %vm38_vm0  ;;  %v1681_v5 = vld [vmem:[%s2181_s1 + $0x18] sm:$0xff]  ;;  %v1692_v7 = vld [vmem:[%s2181_s1 + $0x20] sm:$0xff] }
   0x3   :  { %v1434_v6 = vpack.c.bf16 %v1681_v5, %v1668_v2  ;;  %v1697_v8 = vld [vmem:[%s2181_s1 + $0x28] sm:$0xff]  ;;  %v20_v9 = vld [vmem:[%s2180_s0] sm:$0xff] }
   0x4   :  { %1430 = vmatprep.subr.msk.bf16.mxu0 %vm1674_vm1, %v1428_v3  ;;  %1477 = vmatprep.subr.bf16.mxu1 %v1428_v3 }
   0x5   :  { %1433 = vmatpush3.bf16.xpose.msk.msra.mxu0 %vm1674_vm1, %v1428_v3  ;;  %1479 = vmatpush3.bf16.msra.mxu1 %v1428_v3 }
   0x6   :  { %1436 = vmatprep.subr.msk.bf16.mxu0 %vm1674_vm1, %v1434_v6  ;;  %1481 = vmatprep.subr.bf16.mxu1 %v1434_v6 }
   0x7   :  { %1320 = vmatprep.mubr.msk.f32.mxu0 %vm38_vm0, %v20_v9 }
   0x8   :  { %11 = vsyncpa [#allocation3], 0  ;;  %v1440_v10 = vpack.c.bf16 %v1697_v8, %v1692_v7  ;;  %v1710_v11 = vld [vmem:[%s2181_s1 + $0x30] sm:$0xff]  ;;  %v1715_v12 = vld [vmem:[%s2181_s1 + $0x38] sm:$0xff]  ;;  %v1615_v37 = vmov 1.0|1.0  }
   0x9   :  { %1483 = vmatpush3.bf16.msra.mxu1 %v1434_v6  ;;  %v1446_v13 = vpack.c.bf16 %v1715_v12, %v1710_v11  ;;  %v1724_v14 = vld [vmem:[%s2181_s1 + $0x40] sm:$0xff]  ;;  %v1729_v15 = vld [vmem:[%s2181_s1 + $0x48] sm:$0xff]  ;;  %v1738_v17 = vld [vmem:[%s2181_s1 + $0x50] sm:$0xff]  ;;  %v1616_v38 = vmov 0.0625|0.0625   ;;  %vm388_vm2 = vcmask 130048  }
   0xa   :  { %1485 = vmatprep.subr.bf16.mxu1 %v1440_v10  ;;  %v1452_v16 = vpack.c.bf16 %v1729_v15, %v1724_v14  ;;  %v1743_v18 = vld [vmem:[%s2181_s1 + $0x58] sm:$0xff]  ;;  %v1752_v20 = vld [vmem:[%s2181_s1 + $0x60] sm:$0xff]  ;;  %v1757_v21 = vld [vmem:[%s2181_s1 + $0x68] sm:$0xff]  ;;  %v1617_v63 = vmov 0   ;;  %vm1619_vm3 = vmmov 0  }
   0xb   :  { %v1458_v19 = vpack.c.bf16 %v1743_v18, %v1738_v17  ;;  %v1464_v22 = vpack.c.bf16 %v1757_v21, %v1752_v20  ;;  %v1766_v23 = vld [vmem:[%s2181_s1 + $0x70] sm:$0xff]  ;;  %v1771_v24 = vld [vmem:[%s2181_s1 + $0x78] sm:$0xff]  ;;  %v21_v26 = vld [vmem:[%s2180_s0 + $0x8] sm:$0xff]  ;;  %1541 = vset.pattern.permute.xlu0 %v1617_v63  ;;  %s1622_s0 = smov [#allocation2]  }
   0xc   :  { %v1470_v25 = vpack.c.bf16 %v1771_v24, %v1766_v23  ;;  %s1159_s28 = sshll.u32 %s1622_s0, 4  ;;  %s1160_s28 = int_to_ptr.vmem [resolvable:$true] %s1159_s28 }
   0xd   :  { %1439 = vmatpush3.bf16.xpose.msk.msra.mxu0 %vm1674_vm1, %v1434_v6  ;;  %1487 = vmatpush3.bf16.msra.mxu1 %v1440_v10  ;;  %s1591_s29 = scalar_lea.vmem %s1160_s28, 256  ;;  %p1596_p1 = scmp.lt.s32.totalorder %s1160_s28, %s1160_s28 }
   0xe   :  { %1442 = vmatprep.subr.msk.bf16.mxu0 %vm1674_vm1, %v1440_v10  ;;  %1489 = vmatprep.subr.bf16.mxu1 %v1446_v13  ;;  %p1592_p0 = scmp.ne.s32.totalorder %s1160_s28, %s1591_s29  ;;  %p1597_p2 = scmp.lt.s32.totalorder %s1591_s29, %s1591_s29 }
  0x10   :  { %p1598_p3 = por %p1597_p2, %p1596_p1 }
  0x11   :  { %1491 = vmatpush3.bf16.msra.mxu1 %v1446_v13 }
  0x12   :  { %1493 = vmatprep.subr.bf16.mxu1 %v1452_v16  ;;  %p1599_p4 = pnand %p1598_p3, %p1592_p0 }
  0x15   :  { %1445 = vmatpush3.bf16.xpose.msk.msra.mxu0 %vm1674_vm1, %v1440_v10  ;;  %1495 = vmatpush3.bf16.msra.mxu1 %v1452_v16 }
  0x16   :  { %1448 = vmatprep.subr.msk.bf16.mxu0 %vm1674_vm1, %v1446_v13  ;;  %1497 = vmatprep.subr.bf16.mxu1 %v1458_v19 }
  0x19   :  { %1499 = vmatpush3.bf16.msra.mxu1 %v1458_v19 }
  0x1a   :  { %1501 = vmatprep.subr.bf16.mxu1 %v1464_v22 }
  0x1d   :  { %1451 = vmatpush3.bf16.xpose.msk.msra.mxu0 %vm1674_vm1, %v1446_v13  ;;  %1503 = vmatpush3.bf16.msra.mxu1 %v1464_v22 }
  0x1e   :  { %1454 = vmatprep.subr.msk.bf16.mxu0 %vm1674_vm1, %v1452_v16  ;;  %1505 = vmatprep.subr.bf16.mxu1 %v1470_v25 }
  0x21   :  { %1507 = vmatpush3.bf16.msra.mxu1 %v1470_v25 }
  0x22   :  { %1508 = vmatprep.subr.bf16.mxu1 %v1615_v37 }
  0x25   :  { %1457 = vmatpush3.bf16.xpose.msk.msra.mxu0 %vm1674_vm1, %v1452_v16 }
  0x26   :  { %1460 = vmatprep.subr.msk.bf16.mxu0 %vm1674_vm1, %v1458_v19 }
  0x2d   :  { %1463 = vmatpush3.bf16.xpose.msk.msra.mxu0 %vm1674_vm1, %v1458_v19 }
  0x2e   :  { %1466 = vmatprep.subr.msk.bf16.mxu0 %vm1674_vm1, %v1464_v22 }
  0x35   :  { %1469 = vmatpush3.bf16.xpose.msk.msra.mxu0 %vm1674_vm1, %v1464_v22 }
  0x36   :  { %1472 = vmatprep.subr.msk.bf16.mxu0 %vm1674_vm1, %v1470_v25 }
  0x3d   :  { %1475 = vmatpush3.bf16.xpose.msk.msra.mxu0 %vm1674_vm1, %v1470_v25 }
  0x3e   :  { %1524 = vmatprep.subr.bf16.mxu0 %v1616_v38 }
  0x44   :  { %1321 = vmatmul.mubr.msk.f32.vlgmr.msra.gmra.mrb[0].mxu0 %vm38_vm0, %v21_v26 }
  0x45   :  { %1525 = vmatpush3.bf16.msra.mxu0 %v1616_v38 }
 0x117   :  { %v1322_v27 = vpop.f32.mrb[0].mxu0 }
 0x118   :  { %v1193_v28 = vmul.f32 -1.442695, %v1322_v27  ;;  %v159_v29 = vpop.f32.mrb[1].mxu0 }
 0x119   :  { %v1192_v30 = vmul.f32 -1.442695, %v159_v29  ;;  %168 = vmax.xlane.f32.xlu0 %v159_v29 }
 0x11a   :  { %1543 = vpow2.f32 %v1193_v28 }
 0x11b   :  { %1545 = vpow2.f32 %v1192_v30 }
 0x11d   :  { %170 = vmax.xlane.f32.xlu0 %v1322_v27 }
 0x124   :  { %v1544_v31 = vpop.eup %1543 }
 0x125   :  { %v1546_v32 = vpop.eup %1545  ;;  %v351_v34 = vadd.f32 1.0, %v1544_v31 }
 0x126   :  { %v350_v33 = vadd.f32 1.0, %v1546_v32 }
 0x128   :  { %1547 = vrcp.f32 %v350_v33 }
 0x129   :  { %1549 = vrcp.f32 %v351_v34 }
 0x132   :  { %v1548_v35 = vpop.eup %1547 }
 0x133   :  { %356 = vxpose.xlu1.b32.start [1/2] (short) %v1548_v35, 128  ;;  %v1550_v36 = vpop.eup %1549 }
 0x137   :  { %357 = vxpose.xlu1.b32.end [2/2] (short) %v1550_v36, 128 }
 0x155   :  { %1542 = vset.pattern.permute.xlu1 %v1617_v63 }
 0x1a6   :  { %v169_v39 = vpop.xlane.xlu0 %168 }
 0x1a7   :  { %v172_v40 = vsub.f32 %v159_v29, %v169_v39  ;;  %v1618_v39 = vmov 0.0|0.0  }
 0x1a9   :  { %v174_v41 = vmul.f32 1.442695, %v172_v40 }
 0x1aa   :  { %v171_v42 = vpop.xlane.xlu0 %170 }
 0x1ab   :  { %1551 = vpow2.f32 %v174_v41  ;;  %v173_v43 = vsub.f32 %v1322_v27, %v171_v42  ;;  %v1620_v41 = vmov 0.0  }
 0x1ad   :  { %v176_v44 = vmul.f32 1.442695, %v173_v43 }
 0x1af   :  { %1553 = vpow2.f32 %v176_v44 }
 0x1b3   :  { %v372_v45 = vpop.trf.xlu1 }
 0x1b4   :  { %1397 = vmatprep.mubr.msk.f32.mxu0 %vm388_vm2, %v372_v45 }
 0x1b5   :  { %v1552_v46 = vpop.eup %1551 }
 0x1b6   :  { %1355 = vmatprep.mubr.f32.mxu1 %v1552_v46 }
 0x1b7   :  { %v373_v47 = vpop.trf.xlu1 }
 0x1b8   :  { %1398 = vmatmul.mubr.msk.f32.vlgmr.msra.gmra.mrb[2].mxu0 %vm388_vm2, %v373_v47 }
 0x1b9   :  { %v1554_v48 = vpop.eup %1553 }
 0x1ba   :  { %1356 = vmatmul.mubr.f32.vlgmr.msra.gmra.mrb[0].mxu1 %v1554_v48 }
 0x1bb   :  { %1509 = vmatpush3.bf16.msra.mxu1 %v1615_v37  ;;  %1390 = vmatprep.mubr.f32.mxu1 %v1552_v46  ;;  %v374_v49 = vpop.trf.xlu1 }
 0x1bc   :  { %1510 = vmatprep.subr.bf16.mxu1 %v1615_v37  ;;  %1400 = vmatprep.mubr.msk.f32.mxu0 %vm388_vm2, %v374_v49 }
 0x1bf   :  { %1511 = vmatpush3.bf16.msra.mxu1 %v1615_v37  ;;  %v375_v50 = vpop.trf.xlu1 }
 0x1c0   :  { %1512 = vmatprep.subr.bf16.mxu1 %v1615_v37  ;;  %1401 = vmatmul.mubr.msk.f32.gmra.mrb[4].mxu0 %vm388_vm2, %v375_v50 }
 0x1c3   :  { %1513 = vmatpush3.bf16.msra.mxu1 %v1615_v37  ;;  %v376_v51 = vpop.trf.xlu1 }
 0x1c4   :  { %1514 = vmatprep.subr.bf16.mxu1 %v1615_v37  ;;  %1403 = vmatprep.mubr.msk.f32.mxu0 %vm388_vm2, %v376_v51 }
 0x1c7   :  { %1515 = vmatpush3.bf16.msra.mxu1 %v1615_v37  ;;  %v377_v52 = vpop.trf.xlu1 }
 0x1c8   :  { %1516 = vmatprep.subr.bf16.mxu1 %v1615_v37  ;;  %1404 = vmatmul.mubr.msk.f32.gmra.mrb[6].mxu0 %vm388_vm2, %v377_v52 }
 0x1cb   :  { %1517 = vmatpush3.bf16.msra.mxu1 %v1615_v37  ;;  %v378_v53 = vpop.trf.xlu1 }
 0x1cc   :  { %1518 = vmatprep.subr.bf16.mxu1 %v1615_v37  ;;  %1406 = vmatprep.mubr.msk.f32.mxu0 %vm388_vm2, %v378_v53 }
 0x1cf   :  { %1519 = vmatpush3.bf16.msra.mxu1 %v1615_v37  ;;  %v379_v54 = vpop.trf.xlu1 }
 0x1d0   :  { %1520 = vmatprep.subr.bf16.mxu1 %v1615_v37  ;;  %1407 = vmatmul.mubr.msk.f32.gmra.mrb[8].mxu0 %vm388_vm2, %v379_v54 }
 0x1d3   :  { %1521 = vmatpush3.bf16.msra.mxu1 %v1615_v37  ;;  %v380_v55 = vpop.trf.xlu1 }
 0x1d4   :  { %1522 = vmatprep.subr.bf16.mxu1 %v1615_v37  ;;  %1409 = vmatprep.mubr.msk.f32.mxu0 %vm388_vm2, %v380_v55 }
 0x1d7   :  { %1523 = vmatpush3.bf16.msra.mxu1 %v1615_v37  ;;  %v381_v56 = vpop.trf.xlu1 }
 0x1d8   :  { %1529 = vmatprep.subr.bf16.mxu1 %v1616_v38  ;;  %1410 = vmatmul.mubr.msk.f32.gmra.mrb[10].mxu0 %vm388_vm2, %v381_v56 }
 0x1da   :  { %1391 = vmatmul.mubr.f32.vlgmr.msra.gmra.mrb[2].mxu1 %v1554_v48 }
 0x1db   :  { %v382_v57 = vpop.trf.xlu1  ;;  %1530 = vmatpush3.bf16.msra.mxu1 %v1616_v38 }
 0x1dc   :  { %1412 = vmatprep.mubr.msk.f32.mxu1 %vm388_vm2, %v382_v57  ;;  %1526 = vmatprep.subr.bf16.mxu1 %v1618_v39 }
 0x1df   :  { %v383_v58 = vpop.trf.xlu1 }
 0x1e0   :  { %1413 = vmatmul.mubr.msk.f32.vlgmr.msra.gmra.mrb[4].mxu1 %vm388_vm2, %v383_v58 }
 0x1e3   :  { %v384_v59 = vpop.trf.xlu1 }
 0x1e4   :  { %1415 = vmatprep.mubr.msk.f32.mxu1 %vm388_vm2, %v384_v59 }
 0x1e7   :  { %v385_v60 = vpop.trf.xlu1 }
 0x1e8   :  { %1416 = vmatmul.mubr.msk.f32.gmra.mrb[6].mxu1 %vm388_vm2, %v385_v60 }
 0x1eb   :  { %v386_v61 = vpop.trf.xlu1 }
 0x1ec   :  { %1418 = vmatprep.mubr.msk.f32.mxu1 %vm388_vm2, %v386_v61  ;;  %v1621_v61 = vmov 0.0625  }
 0x1ef   :  { %v387_v62 = vpop.trf.xlu1 }
 0x1f0   :  { %1419 = vmatmul.mubr.msk.f32.gmra.mrb[8].mxu1 %vm388_vm2, %v387_v62 }
 0x1f1   :  { %1425 = vmatprep.mubr.msk.f32.mxu1 %vm1619_vm3, %v1620_v41 }
 0x28b   :  { %v1399_v3 = vpop.f32.mrb[2].mxu0 }
 0x28c   :  { %v1813_v4 = vpop.f32.mrb[3].mxu0  ;;  %v656_v40 = vsub.f32 1.0, %v1399_v3 }
 0x28d   :  { %v1815_v6 = vpop.f32.mrb[0].mxu1  ;;  %v655_v35 = vsub.f32 1.0, %v1813_v4 }
 0x28e   :  { %v1817_v9 = vpop.f32.mrb[1].mxu1 }
 0x293   :  { %v1402_v10 = vpop.f32.mrb[4].mxu0 }
 0x294   :  { %v1819_v13 = vpop.f32.mrb[5].mxu0  ;;  %v658_v45 = vsub.f32 1.0, %v1402_v10 }
 0x295   :  { %v657_v42 = vsub.f32 1.0, %v1819_v13 }
 0x29b   :  { %v1405_v16 = vpop.f32.mrb[6].mxu0 }
 0x29c   :  { %v1821_v19 = vpop.f32.mrb[7].mxu0  ;;  %v660_v47 = vsub.f32 1.0, %v1405_v16 }
 0x29d   :  { %v659_v46 = vsub.f32 1.0, %v1821_v19 }
 0x2a3   :  { %v1408_v22 = vpop.f32.mrb[8].mxu0 }
 0x2a4   :  { %v533_v25 = vpop.f32.mrb[9].mxu0  ;;  %v662_v49 = vsub.f32 1.0, %v1408_v22 }
 0x2a5   :  { %v661_v48 = vsub.f32 1.0, %v533_v25 }
 0x2ab   :  { %v1411_v26 = vpop.f32.mrb[10].mxu0 }
 0x2ac   :  { %v543_v27 = vpop.f32.mrb[11].mxu0  ;;  %v664_v52 = vsub.f32 1.0, %v1411_v26 }
 0x2ad   :  { %v1392_v28 = vpop.f32.mrb[2].mxu1  ;;  %v663_v50 = vsub.f32 1.0, %v543_v27 }
 0x2ae   :  { %1555 = vrcp.f32 %v1392_v28  ;;  %v319_v29 = vpop.f32.mrb[3].mxu1 }
 0x2af   :  { %1557 = vrcp.f32 %v319_v29 }
 0x2b3   :  { %v1414_v30 = vpop.f32.mrb[4].mxu1 }
 0x2b4   :  { %v553_v31 = vpop.f32.mrb[5].mxu1  ;;  %v666_v34 = vsub.f32 1.0, %v1414_v30 }
 0x2b5   :  { %v665_v53 = vsub.f32 1.0, %v553_v31 }
 0x2b8   :  { %v1556_v32 = vpop.eup %1555 }
 0x2b9   :  { %v1558_v33 = vpop.eup %1557  ;;  %337 = vperm.xlu1 %1542, %v1556_v32  }
 0x2ba   :  { %332 = vperm.xlu0 %1541, %v1558_v33   ;;  %v767_v33 = vlaneseq }
 0x2bb   :  { %v1417_v36 = vpop.f32.mrb[6].mxu1 }
 0x2bc   :  { %v563_v37 = vpop.f32.mrb[7].mxu1  ;;  %v668_v38 = vsub.f32 1.0, %v1417_v36 }
 0x2bd   :  { %728 = vperm.xlu1 %1542, %v666_v34   ;;  %v667_v54 = vsub.f32 1.0, %v563_v37 }
 0x2be   :  { %673 = vperm.xlu0 %1541, %v655_v35   ;;  %v768_v35 = vshrl.u32 %v767_v33, 7 }
 0x2c1   :  { %738 = vperm.xlu1 %1542, %v668_v38  }
 0x2c2   :  { %678 = vperm.xlu0 %1541, %v656_v40  }
 0x2c3   :  { %v1420_v43 = vpop.f32.mrb[8].mxu1 }
 0x2c4   :  { %v573_v44 = vpop.f32.mrb[9].mxu1  ;;  %v670_v51 = vsub.f32 1.0, %v1420_v43 }
 0x2c5   :  { %778 = vperm.xlu1 %1542, %v1399_v3   ;;  %v669_v55 = vsub.f32 1.0, %v573_v44 }
 0x2c6   :  { %683 = vperm.xlu0 %1541, %v657_v42  }
 0x2c9   :  { %788 = vperm.xlu1 %1542, %v1402_v10  }
 0x2ca   :  { %688 = vperm.xlu0 %1541, %v658_v45  }
 0x2cd   :  { %798 = vperm.xlu1 %1542, %v1405_v16  }
 0x2ce   :  { %693 = vperm.xlu0 %1541, %v659_v46  }
 0x2d1   :  { %808 = vperm.xlu1 %1542, %v1408_v22  }
 0x2d2   :  { %698 = vperm.xlu0 %1541, %v660_v47  }
 0x2d5   :  { %818 = vperm.xlu1 %1542, %v1411_v26  }
 0x2d6   :  { %703 = vperm.xlu0 %1541, %v661_v48  }
 0x2d9   :  { %828 = vperm.xlu1 %1542, %v1414_v30  }
 0x2da   :  { %708 = vperm.xlu0 %1541, %v662_v49  }
 0x2dd   :  { %838 = vperm.xlu1 %1542, %v1417_v36  }
 0x2de   :  { %713 = vperm.xlu0 %1541, %v663_v50  }
 0x2e1   :  { %748 = vperm.xlu1 %1542, %v670_v51  }
 0x2e2   :  { %718 = vperm.xlu0 %1541, %v664_v52  }
 0x2e5   :  { %848 = vperm.xlu1 %1542, %v1420_v43  }
 0x2e6   :  { %723 = vperm.xlu0 %1541, %v665_v53  }
 0x2ea   :  { %733 = vperm.xlu0 %1541, %v667_v54  }
 0x2ee   :  { %773 = vperm.xlu0 %1541, %v1813_v4  }
 0x2f2   :  { %783 = vperm.xlu0 %1541, %v1819_v13  }
 0x2f6   :  { %793 = vperm.xlu0 %1541, %v1821_v19  }
 0x2fa   :  { %803 = vperm.xlu0 %1541, %v533_v25  }
 0x2fe   :  { %813 = vperm.xlu0 %1541, %v543_v27  }
 0x302   :  { %823 = vperm.xlu0 %1541, %v553_v31  }
 0x306   :  { %833 = vperm.xlu0 %1541, %v563_v37   ;;  %v769_v37 = vsub.s32 0, %v768_v35 }
 0x30a   :  { %843 = vperm.xlu0 %1541, %v573_v44  }
 0x30e   :  { %743 = vperm.xlu0 %1541, %v669_v55  }
 0x338   :  { %v338_v56 = vpop.permute.xlu1 %337 }
 0x339   :  { %v341_v57 = vmul.f32 %v1815_v6, %v338_v56  ;;  %v333_v58 = vpop.permute.xlu0 %332 }
 0x33a   :  { %v340_v59 = vmul.f32 %v333_v58, %v1817_v9 }
 0x33b   :  { %343 = vst.msk [vmem:[#allocation2 + $0x8] sm:$0xff] %vm38_vm0, %v341_v57 }
 0x33c   :  { %342 = vst.msk [vmem:[#allocation2] sm:$0xff] %vm38_vm0, %v340_v59  ;;  %v1527_v60 = vpack.c.bf16 %v341_v57, %v340_v59  ;;  %v1842_v26 = vpop.permute.xlu1 %728 }
 0x33d   :  { %v674_v62 = vpop.permute.xlu0 %673 }
 0x33e   :  { %1528 = vmatpush3.bf16.msra.mxu1 %v1527_v60  ;;  %v751_v43 = vmul.f32 %v674_v62, %v1658_v0 }
 0x340   :  { %v1844_v28 = vpop.permute.xlu1 %738 }
 0x341   :  { %1426 = vmatmul.mubr.msk.f32.vlgmr.msra.gmra.mrb[10].mxu1 %vm388_vm2, %v1621_v61  ;;  %v679_v63 = vpop.permute.xlu0 %678 }
 0x342   :  { %v752_v44 = vmul.f32 %v679_v63, %v1663_v1 }
 0x344   :  { %v779_v30 = vpop.permute.xlu1 %778 }
 0x345   :  { %v684_v3 = vpop.permute.xlu0 %683 }
 0x346   :  { %v753_v50 = vmul.f32 %v684_v3, %v1668_v2 }
 0x348   :  { %v789_v32 = vpop.permute.xlu1 %788 }
 0x349   :  { %v689_v4 = vpop.permute.xlu0 %688 }
 0x34c   :  { %v799_v36 = vpop.permute.xlu1 %798 }
 0x34d   :  { %v694_v10 = vpop.permute.xlu0 %693 }
 0x34e   :  { %v755_v51 = vmul.f32 %v694_v10, %v1692_v7  ;;  %v754_v7 = vmul.f32 %v689_v4, %v1681_v5 }
 0x350   :  { %v809_v39 = vpop.permute.xlu1 %808 }
 0x351   :  { %v699_v13 = vpop.permute.xlu0 %698 }
 0x354   :  { %v819_v0 = vpop.permute.xlu1 %818 }
 0x355   :  { %v704_v16 = vpop.permute.xlu0 %703 }
 0x356   :  { %v757_v58 = vmul.f32 %v704_v16, %v1710_v11 }
 0x358   :  { %v829_v5 = vpop.permute.xlu1 %828 }
 0x359   :  { %v1834_v6 = vpop.permute.xlu0 %708 }
 0x35d   :  { %v714_v19 = vpop.permute.xlu0 %713 }
 0x35e   :  { %v759_v11 = vmul.f32 %v714_v19, %v1724_v14  ;;  %v758_v14 = vmul.f32 %v1834_v6, %v1715_v12  ;;  %v839_v19 = vpop.permute.xlu1 %838 }
 0x361   :  { %v1836_v9 = vpop.permute.xlu0 %718 }
 0x362   :  { %v760_v12 = vmul.f32 %v1836_v9, %v1729_v15  ;;  %v762_v15 = vmul.f32 %v1842_v26, %v1743_v18 }
 0x365   :  { %v1838_v22 = vpop.permute.xlu0 %723 }
 0x369   :  { %v1840_v25 = vpop.permute.xlu0 %733 }
 0x36d   :  { %v774_v27 = vpop.permute.xlu0 %773 }
 0x371   :  { %v784_v29 = vpop.permute.xlu0 %783 }
 0x375   :  { %v794_v31 = vpop.permute.xlu0 %793 }
 0x379   :  { %v804_v34 = vpop.permute.xlu0 %803 }
 0x37d   :  { %v814_v38 = vpop.permute.xlu0 %813 }
 0x381   :  { %v824_v49 = vpop.permute.xlu0 %823 }
 0x385   :  { %v834_v59 = vpop.permute.xlu0 %833 }
 0x414   :  { %v651_v40 = vpop.f32.mrb[10].mxu1 }
 0x415   :  { %v1846_v41 = vrot.slane %v651_v40, %v769_v37  ;;  %v1427_v42 = vpop.f32.mrb[11].mxu1 }
 0x417   :  { %v851_v45 = vmul.f32 %v774_v27, %v1846_v41  ;;  %v852_v46 = vmul.f32 %v779_v30, %v1846_v41  ;;  %v853_v47 = vmul.f32 %v784_v29, %v1846_v41  ;;  %v855_v48 = vmul.f32 %v794_v31, %v1846_v41 }
 0x418   :  { %v857_v1 = vmul.f32 %v804_v34, %v1846_v41  ;;  %v854_v54 = vmul.f32 %v789_v32, %v1846_v41  ;;  %v859_v60 = vmul.f32 %v814_v38, %v1846_v41  ;;  %v856_v61 = vmul.f32 %v799_v36, %v1846_v41 }
 0x419   :  { %v1856_v52 = vadd.f32 %v851_v45, %v751_v43  ;;  %v1858_v53 = vadd.f32 %v852_v46, %v752_v44  ;;  %v1866_v57 = vadd.f32 %v853_v47, %v753_v50  ;;  %v1868_v2 = vadd.f32 %v855_v48, %v755_v51  ;;  %v749_v45 = vpop.permute.xlu1 %748 }
 0x41a   :  { %v1878_v3 = vadd.f32 %v857_v1, %v757_v58  ;;  %v1880_v10 = vadd.f32 %v854_v54, %v754_v7  ;;  %v756_v27 = vmul.f32 %v699_v13, %v1697_v8  ;;  %v1884_v4 = vadd.f32 %v859_v60, %v759_v11  ;;  %v844_v8 = vpop.permute.xlu0 %843 }
 0x41b   :  { %v883_v55 = vsel %vm38_vm0, %v1856_v52, 0.0  ;;  %v886_v56 = vsel %vm38_vm0, %v1858_v53, 0.0  ;;  %v889_v62 = vsel %vm38_vm0, %v1866_v57, 0.0  ;;  %v895_v63 = vsel %vm38_vm0, %v1868_v2, 0.0 }
 0x41c   :  { %884 = vadd.xlane.f32.xlu0 %v883_v55  ;;  %887 = vadd.xlane.f32.xlu1 %v886_v56  ;;  %v1886_v16 = vadd.f32 %v856_v61, %v756_v27  ;;  %v901_v29 = vsel %vm38_vm0, %v1878_v3, 0.0  ;;  %v892_v30 = vsel %vm38_vm0, %v1880_v10, 0.0  ;;  %v861_v31 = vmul.f32 %v824_v49, %v1846_v41 }
 0x41d   :  { %v858_v32 = vmul.f32 %v809_v39, %v1846_v41  ;;  %v761_v13 = vmul.f32 %v1838_v22, %v1738_v17  ;;  %v907_v33 = vsel %vm38_vm0, %v1884_v4, 0.0  ;;  %v863_v37 = vmul.f32 %v834_v59, %v1846_v41  ;;  %v849_v18 = vpop.permute.xlu1 %848 }
 0x41e   :  { %v898_v34 = vsel %vm38_vm0, %v1886_v16, 0.0  ;;  %v860_v38 = vmul.f32 %v819_v0, %v1846_v41  ;;  %v763_v17 = vmul.f32 %v1840_v25, %v1752_v20  ;;  %v744_v6 = vpop.permute.xlu0 %743  ;;  %v865_v22 = vmul.f32 %v844_v8, %v1846_v41 }
 0x41f   :  { %v1902_v35 = vadd.f32 %v861_v31, %v761_v13  ;;  %v1904_v36 = vadd.f32 %v858_v32, %v758_v14  ;;  %v862_v39 = vmul.f32 %v829_v5, %v1846_v41  ;;  %v765_v20 = vmul.f32 %v744_v6, %v1766_v23 }
 0x420   :  { %890 = vadd.xlane.f32.xlu0 %v889_v62  ;;  %896 = vadd.xlane.f32.xlu1 %v895_v63  ;;  %v1918_v43 = vadd.f32 %v863_v37, %v763_v17  ;;  %v1920_v44 = vadd.f32 %v860_v38, %v760_v12  ;;  %v864_v9 = vmul.f32 %v839_v19, %v1846_v41 }
 0x421   :  { %v913_v40 = vsel %vm38_vm0, %v1902_v35, 0.0  ;;  %v904_v42 = vsel %vm38_vm0, %v1904_v36, 0.0  ;;  %v1930_v47 = vadd.f32 %v865_v22, %v765_v20  ;;  %v1932_v48 = vadd.f32 %v862_v39, %v762_v15 }
 0x422   :  { %v919_v25 = vsel %vm38_vm0, %v1918_v43, 0.0  ;;  %v910_v46 = vsel %vm38_vm0, %v1920_v44, 0.0  ;;  %v764_v49 = vmul.f32 %v1844_v28, %v1757_v21  ;;  %v866_v51 = vmul.f32 %v849_v18, %v1846_v41 }
 0x423   :  { %v925_v23 = vsel %vm38_vm0, %v1930_v47, 0.0  ;;  %v916_v26 = vsel %vm38_vm0, %v1932_v48, 0.0  ;;  %v766_v0 = vmul.f32 %v749_v45, %v1771_v24 }
 0x424   :  { %902 = vadd.xlane.f32.xlu1 %v901_v29  ;;  %893 = vadd.xlane.f32.xlu0 %v892_v30  ;;  %v1940_v50 = vadd.f32 %v864_v9, %v764_v49 }
 0x425   :  { %v1946_v54 = vadd.f32 %v866_v51, %v766_v0 }
 0x426   :  { %v922_v1 = vsel %vm38_vm0, %v1940_v50, 0.0 }
 0x427   :  { %v928_v21 = vsel %vm38_vm0, %v1946_v54, 0.0 }
 0x428   :  { %908 = vadd.xlane.f32.xlu1 %v907_v33  ;;  %899 = vadd.xlane.f32.xlu0 %v898_v34 }
 0x42c   :  { %914 = vadd.xlane.f32.xlu1 %v913_v40  ;;  %905 = vadd.xlane.f32.xlu0 %v904_v42 }
 0x430   :  { %920 = vadd.xlane.f32.xlu1 %v919_v25  ;;  %911 = vadd.xlane.f32.xlu0 %v910_v46 }
 0x434   :  { %926 = vadd.xlane.f32.xlu1 %v925_v23  ;;  %917 = vadd.xlane.f32.xlu0 %v916_v26 }
 0x438   :  { %923 = vadd.xlane.f32.xlu0 %v922_v1 }
 0x43c   :  { %929 = vadd.xlane.f32.xlu0 %v928_v21 }
 0x4a9   :  { %v885_v28 = vpop.xlane.xlu0 %884  ;;  %v888_v55 = vpop.xlane.xlu1 %887 }
 0x4aa   :  { %v932_v56 = vmul.f32 0.03125, %v885_v28  ;;  %v933_v7 = vmul.f32 0.03125, %v888_v55 }
 0x4ac   :  { %v1951_v41 = vsub.f32 %v1856_v52, %v932_v56  ;;  %v1954_v58 = vsub.f32 %v1858_v53, %v933_v7 }
 0x4ad   :  { %v891_v24 = vpop.xlane.xlu0 %890  ;;  %v897_v59 = vpop.xlane.xlu1 %896 }
 0x4ae   :  { %v934_v60 = vmul.f32 0.03125, %v891_v24  ;;  %v936_v61 = vmul.f32 0.03125, %v897_v59  ;;  %v964_v62 = vmul.f32 %v1951_v41, %v1951_v41  ;;  %v965_v63 = vmul.f32 %v1954_v58, %v1954_v58 }
 0x4b0   :  { %v1961_v27 = vsub.f32 %v1866_v57, %v934_v60  ;;  %v1964_v5 = vsub.f32 %v1868_v2, %v936_v61  ;;  %v980_v52 = vsel %vm38_vm0, %v964_v62, 0.0  ;;  %v983_v53 = vsel %vm38_vm0, %v965_v63, 0.0 }
 0x4b1   :  { %981 = vadd.xlane.f32.xlu1 %v980_v52  ;;  %v894_v11 = vpop.xlane.xlu0 %893  ;;  %984 = vadd.xlane.f32.xlu0 %v983_v53  ;;  %v903_v29 = vpop.xlane.xlu1 %902 }
 0x4b2   :  { %v935_v30 = vmul.f32 0.03125, %v894_v11  ;;  %v938_v31 = vmul.f32 0.03125, %v903_v29  ;;  %v966_v32 = vmul.f32 %v1961_v27, %v1961_v27  ;;  %v968_v14 = vmul.f32 %v1964_v5, %v1964_v5 }
 0x4b4   :  { %v1971_v8 = vsub.f32 %v1880_v10, %v935_v30  ;;  %v1974_v57 = vsub.f32 %v1878_v3, %v938_v31  ;;  %v986_v2 = vsel %vm38_vm0, %v966_v32, 0.0  ;;  %v992_v17 = vsel %vm38_vm0, %v968_v14, 0.0 }
 0x4b5   :  { %987 = vadd.xlane.f32.xlu1 %v986_v2  ;;  %v900_v13 = vpop.xlane.xlu0 %899  ;;  %v909_v19 = vpop.xlane.xlu1 %908 }
 0x4b6   :  { %v937_v33 = vmul.f32 0.03125, %v900_v13  ;;  %v940_v34 = vmul.f32 0.03125, %v909_v19  ;;  %v967_v37 = vmul.f32 %v1971_v8, %v1971_v8  ;;  %v970_v10 = vmul.f32 %v1974_v57, %v1974_v57 }
 0x4b8   :  { %v1984_v38 = vsub.f32 %v1886_v16, %v937_v33  ;;  %v1987_v3 = vsub.f32 %v1884_v4, %v940_v34  ;;  %v989_v12 = vsel %vm38_vm0, %v967_v37, 0.0  ;;  %v998_v45 = vsel %vm38_vm0, %v970_v10, 0.0 }
 0x4b9   :  { %v906_v6 = vpop.xlane.xlu0 %905  ;;  %990 = vadd.xlane.f32.xlu0 %v989_v12  ;;  %993 = vadd.xlane.f32.xlu1 %v992_v17  ;;  %v915_v22 = vpop.xlane.xlu1 %914 }
 0x4ba   :  { %v939_v39 = vmul.f32 0.03125, %v906_v6  ;;  %v942_v40 = vmul.f32 0.03125, %v915_v22  ;;  %v969_v42 = vmul.f32 %v1984_v38, %v1984_v38  ;;  %v972_v20 = vmul.f32 %v1987_v3, %v1987_v3 }
 0x4bc   :  { %v1995_v16 = vsub.f32 %v1904_v36, %v939_v39  ;;  %v1998_v4 = vsub.f32 %v1902_v35, %v942_v40  ;;  %v995_v15 = vsel %vm38_vm0, %v969_v42, 0.0  ;;  %v1004_v51 = vsel %vm38_vm0, %v972_v20, 0.0 }
 0x4bd   :  { %v912_v9 = vpop.xlane.xlu0 %911  ;;  %996 = vadd.xlane.f32.xlu0 %v995_v15  ;;  %999 = vadd.xlane.f32.xlu1 %v998_v45  ;;  %v921_v25 = vpop.xlane.xlu1 %920 }
 0x4be   :  { %v941_v46 = vmul.f32 0.03125, %v912_v9  ;;  %v944_v49 = vmul.f32 0.03125, %v921_v25  ;;  %v971_v18 = vmul.f32 %v1995_v16, %v1995_v16  ;;  %v974_v36 = vmul.f32 %v1998_v4, %v1998_v4 }
 0x4c0   :  { %v2008_v35 = vsub.f32 %v1920_v44, %v941_v46  ;;  %v2011_v23 = vsub.f32 %v1918_v43, %v944_v49  ;;  %v1001_v26 = vsel %vm38_vm0, %v971_v18, 0.0  ;;  %v1010_v56 = vsel %vm38_vm0, %v974_v36, 0.0 }
 0x4c1   :  { %v918_v0 = vpop.xlane.xlu0 %917  ;;  %1002 = vadd.xlane.f32.xlu0 %v1001_v26  ;;  %1005 = vadd.xlane.f32.xlu1 %v1004_v51  ;;  %v927_v1 = vpop.xlane.xlu1 %926 }
 0x4c2   :  { %v943_v21 = vmul.f32 0.03125, %v918_v0  ;;  %v946_v28 = vmul.f32 0.03125, %v927_v1  ;;  %v973_v55 = vmul.f32 %v2008_v35, %v2008_v35  ;;  %v976_v24 = vmul.f32 %v2011_v23, %v2011_v23 }
 0x4c4   :  { %v2019_v44 = vsub.f32 %v1932_v48, %v943_v21  ;;  %v2022_v43 = vsub.f32 %v1930_v47, %v946_v28  ;;  %v1007_v7 = vsel %vm38_vm0, %v973_v55, 0.0  ;;  %v1016_v47 = vsel %vm38_vm0, %v976_v24, 0.0 }
 0x4c5   :  { %v924_v59 = vpop.xlane.xlu0 %923  ;;  %1008 = vadd.xlane.f32.xlu0 %v1007_v7  ;;  %1011 = vadd.xlane.f32.xlu1 %v1010_v56 }
 0x4c6   :  { %v945_v60 = vmul.f32 0.03125, %v924_v59  ;;  %v975_v61 = vmul.f32 %v2019_v44, %v2019_v44  ;;  %v978_v63 = vmul.f32 %v2022_v43, %v2022_v43 }
 0x4c8   :  { %v2030_v62 = vsub.f32 %v1940_v50, %v945_v60  ;;  %v1013_v48 = vsel %vm38_vm0, %v975_v61, 0.0  ;;  %v1022_v30 = vsel %vm38_vm0, %v978_v63, 0.0 }
 0x4c9   :  { %v930_v52 = vpop.xlane.xlu0 %929  ;;  %1014 = vadd.xlane.f32.xlu0 %v1013_v48  ;;  %1017 = vadd.xlane.f32.xlu1 %v1016_v47 }
 0x4ca   :  { %v947_v53 = vmul.f32 0.03125, %v930_v52  ;;  %v977_v11 = vmul.f32 %v2030_v62, %v2030_v62 }
 0x4cc   :  { %v2039_v29 = vsub.f32 %v1946_v54, %v947_v53  ;;  %v1019_v50 = vsel %vm38_vm0, %v977_v11, 0.0 }
 0x4cd   :  { %1020 = vadd.xlane.f32.xlu0 %v1019_v50  ;;  %1023 = vadd.xlane.f32.xlu1 %v1022_v30 }
 0x4ce   :  { %v979_v31 = vmul.f32 %v2039_v29, %v2039_v29 }
 0x4d0   :  { %v1025_v32 = vsel %vm38_vm0, %v979_v31, 0.0 }
 0x4d1   :  { %1026 = vadd.xlane.f32.xlu0 %v1025_v32 }
 0x4d2   :  { %1602 = shalt.err (!%p1599_p4)
}
 0x4d3   :  { %s1603_s7 = scalar_lea.hbm %s2184_s4, 256 }
 0x4d4   :  { %p1604_p5 = scmp.ne.s32.totalorder %s2184_s4, %s1603_s7  ;;  %p1607_p6 = scmp.lt.u32.totalorder %s1603_s7, %s2184_s4 }
 0x4d6   :  { %p1609_p7 = pnand %p1607_p6, %p1604_p5 }
 0x4d8   :  { %1612 = shalt.err (!%p1609_p7)
}
 0x4d9   :  { %s1623_s12 = smov 128   ;;  %s1624_s13 = smov 8   ;;  %v2061_v25 = vld [vmem:[%s2182_s2] ss:$0 sm:$0xff] }
 0x4da   :  { %1165 = dma.vmem_to_hbm [thread:$0]  %s1160_s28, 256, %s2184_s4, [#allocation3], %s1623_s12, %s1623_s12, %s1624_s13  }
 0x4db   :  { %v2067_v0 = vld [vmem:[%s2183_s3] ss:$0 sm:$0xff] }
 0x53e   :  { %v985_v54 = vpop.xlane.xlu0 %984  ;;  %v982_v2 = vpop.xlane.xlu1 %981 }
 0x53f   :  { %v1029_v14 = vmul.f32 0.03125, %v985_v54  ;;  %v1028_v13 = vmul.f32 0.03125, %v982_v2 }
 0x541   :  { %v1045_v19 = vadd.f32 1e-05, %v1029_v14  ;;  %v1044_v33 = vadd.f32 1e-05, %v1028_v13 }
 0x542   :  { %v988_v34 = vpop.xlane.xlu1 %987 }
 0x543   :  { %1559 = vrsqrt.f32 %v1045_v19  ;;  %v1030_v37 = vmul.f32 0.03125, %v988_v34 }
 0x544   :  { %1561 = vrsqrt.f32 %v1044_v33 }
 0x545   :  { %v1046_v10 = vadd.f32 1e-05, %v1030_v37 }
 0x546   :  { %v991_v12 = vpop.xlane.xlu0 %990  ;;  %v994_v17 = vpop.xlane.xlu1 %993 }
 0x547   :  { %1563 = vrsqrt.f32 %v1046_v10  ;;  %v1031_v6 = vmul.f32 0.03125, %v991_v12  ;;  %v1032_v22 = vmul.f32 0.03125, %v994_v17 }
 0x549   :  { %v1047_v39 = vadd.f32 1e-05, %v1031_v6  ;;  %v1048_v40 = vadd.f32 1e-05, %v1032_v22 }
 0x54a   :  { %v997_v42 = vpop.xlane.xlu0 %996  ;;  %v1000_v45 = vpop.xlane.xlu1 %999 }
 0x54b   :  { %1565 = vrsqrt.f32 %v1047_v39  ;;  %v1033_v15 = vmul.f32 0.03125, %v997_v42  ;;  %v1034_v20 = vmul.f32 0.03125, %v1000_v45 }
 0x54c   :  { %1567 = vrsqrt.f32 %v1048_v40 }
 0x54d   :  { %v1560_v9 = vpop.eup %1559  ;;  %v1049_v46 = vadd.f32 1e-05, %v1033_v15  ;;  %v1050_v49 = vadd.f32 1e-05, %v1034_v20 }
 0x54e   :  { %v1562_v18 = vpop.eup %1561  ;;  %v1077_v36 = vmul.f32 %v1560_v9, %v1954_v58  ;;  %v1003_v26 = vpop.xlane.xlu0 %1002 }
 0x54f   :  { %v1006_v51 = vpop.xlane.xlu1 %1005  ;;  %v1076_v1 = vmul.f32 %v1562_v18, %v1951_v41  ;;  %1569 = vrsqrt.f32 %v1049_v46  ;;  %v1035_v21 = vmul.f32 0.03125, %v1003_v26 }
 0x550   :  { %v1036_v28 = vmul.f32 0.03125, %v1006_v51  ;;  %v1100_v55 = vmul.f32 %v2061_v25, %v1077_v36  ;;  %1571 = vrsqrt.f32 %v1050_v49 }
 0x551   :  { %v1564_v56 = vpop.eup %1563  ;;  %v1099_v7 = vmul.f32 %v2061_v25, %v1076_v1  ;;  %v1051_v24 = vadd.f32 1e-05, %v1035_v21 }
 0x552   :  { %v1052_v58 = vadd.f32 1e-05, %v1036_v28  ;;  %v1123_v59 = vadd.f32 %v2067_v0, %v1100_v55  ;;  %v1078_v60 = vmul.f32 %v1564_v56, %v1961_v27  ;;  %v1009_v61 = vpop.xlane.xlu0 %1008 }
 0x553   :  { %v1012_v48 = vpop.xlane.xlu1 %1011  ;;  %v1122_v47 = vadd.f32 %v2067_v0, %v1099_v7  ;;  %1573 = vrsqrt.f32 %v1051_v24  ;;  %v1037_v41 = vmul.f32 0.03125, %v1009_v61 }
 0x554   :  { %v1038_v63 = vmul.f32 0.03125, %v1012_v48  ;;  %1139 = vst.msk [vmem:[%s2185_s5 + $0x8] sm:$0xff] %vm38_vm0, %v1123_v59  ;;  %v1101_v52 = vmul.f32 %v2061_v25, %v1078_v60  ;;  %1575 = vrsqrt.f32 %v1052_v58 }
 0x555   :  { %v1566_v53 = vpop.eup %1565  ;;  %1138 = vst.msk [vmem:[%s2185_s5] sm:$0xff] %vm38_vm0, %v1122_v47  ;;  %v1053_v27 = vadd.f32 1e-05, %v1037_v41 }
 0x556   :  { %v1054_v11 = vadd.f32 1e-05, %v1038_v63  ;;  %v1568_v50 = vpop.eup %1567  ;;  %v1124_v30 = vadd.f32 %v2067_v0, %v1101_v52  ;;  %v1079_v31 = vmul.f32 %v1566_v53, %v1971_v8  ;;  %v1015_v32 = vpop.xlane.xlu0 %1014 }
 0x557   :  { %v1018_v54 = vpop.xlane.xlu1 %1017  ;;  %v1080_v2 = vmul.f32 %v1568_v50, %v1964_v5  ;;  %1577 = vrsqrt.f32 %v1053_v27  ;;  %v1039_v14 = vmul.f32 0.03125, %v1015_v32 }
 0x558   :  { %v1040_v13 = vmul.f32 0.03125, %v1018_v54  ;;  %1140 = vst.msk [vmem:[%s2185_s5 + $0x10] sm:$0xff] %vm38_vm0, %v1124_v30  ;;  %v1102_v19 = vmul.f32 %v2061_v25, %v1079_v31  ;;  %1579 = vrsqrt.f32 %v1054_v11 }
 0x559   :  { %v1570_v33 = vpop.eup %1569  ;;  %v1103_v34 = vmul.f32 %v2061_v25, %v1080_v2  ;;  %v1055_v37 = vadd.f32 1e-05, %v1039_v14 }
 0x55a   :  { %v1056_v8 = vadd.f32 1e-05, %v1040_v13  ;;  %v1572_v10 = vpop.eup %1571  ;;  %v1125_v12 = vadd.f32 %v2067_v0, %v1102_v19  ;;  %v1081_v5 = vmul.f32 %v1570_v33, %v1984_v38  ;;  %v1021_v17 = vpop.xlane.xlu0 %1020 }
 0x55b   :  { %v1024_v6 = vpop.xlane.xlu1 %1023  ;;  %v1126_v22 = vadd.f32 %v2067_v0, %v1103_v34  ;;  %v1082_v39 = vmul.f32 %v1572_v10, %v1974_v57  ;;  %1581 = vrsqrt.f32 %v1055_v37  ;;  %v1041_v40 = vmul.f32 0.03125, %v1021_v17 }
 0x55c   :  { %1141 = vst.msk [vmem:[%s2185_s5 + $0x18] sm:$0xff] %vm38_vm0, %v1125_v12  ;;  %v1104_v42 = vmul.f32 %v2061_v25, %v1081_v5  ;;  %1583 = vrsqrt.f32 %v1056_v8  ;;  %v1042_v45 = vmul.f32 0.03125, %v1024_v6 }
 0x55d   :  { %v1574_v15 = vpop.eup %1573  ;;  %1142 = vst.msk [vmem:[%s2185_s5 + $0x20] sm:$0xff] %vm38_vm0, %v1126_v22  ;;  %v1105_v38 = vmul.f32 %v2061_v25, %v1082_v39  ;;  %v1057_v57 = vadd.f32 1e-05, %v1041_v40 }
 0x55e   :  { %v1576_v20 = vpop.eup %1575  ;;  %v1127_v9 = vadd.f32 %v2067_v0, %v1104_v42  ;;  %v1083_v46 = vmul.f32 %v1574_v15, %v1995_v16  ;;  %v1058_v49 = vadd.f32 1e-05, %v1042_v45  ;;  %v1027_v18 = vpop.xlane.xlu0 %1026 }
 0x55f   :  { %v1128_v36 = vadd.f32 %v2067_v0, %v1105_v38  ;;  %v1084_v26 = vmul.f32 %v1576_v20, %v1987_v3  ;;  %1585 = vrsqrt.f32 %v1057_v57  ;;  %v1043_v51 = vmul.f32 0.03125, %v1027_v18 }
 0x560   :  { %1143 = vst.msk [vmem:[%s2185_s5 + $0x28] sm:$0xff] %vm38_vm0, %v1127_v9  ;;  %v1106_v1 = vmul.f32 %v2061_v25, %v1083_v46  ;;  %1587 = vrsqrt.f32 %v1058_v49 }
 0x561   :  { %v1578_v21 = vpop.eup %1577  ;;  %1144 = vst.msk [vmem:[%s2185_s5 + $0x30] sm:$0xff] %vm38_vm0, %v1128_v36  ;;  %v1107_v16 = vmul.f32 %v2061_v25, %v1084_v26  ;;  %v1059_v28 = vadd.f32 1e-05, %v1043_v51 }
 0x562   :  { %v1580_v3 = vpop.eup %1579  ;;  %v1129_v55 = vadd.f32 %v2067_v0, %v1106_v1  ;;  %v1085_v56 = vmul.f32 %v1578_v21, %v2008_v35 }
 0x563   :  { %v1130_v7 = vadd.f32 %v2067_v0, %v1107_v16  ;;  %v1086_v24 = vmul.f32 %v1580_v3, %v1998_v4  ;;  %1589 = vrsqrt.f32 %v1059_v28 }
 0x564   :  { %1145 = vst.msk [vmem:[%s2185_s5 + $0x38] sm:$0xff] %vm38_vm0, %v1129_v55  ;;  %v1108_v58 = vmul.f32 %v2061_v25, %v1085_v56 }
 0x565   :  { %v1582_v59 = vpop.eup %1581  ;;  %1146 = vst.msk [vmem:[%s2185_s5 + $0x40] sm:$0xff] %vm38_vm0, %v1130_v7  ;;  %v1109_v35 = vmul.f32 %v2061_v25, %v1086_v24 }
 0x566   :  { %v1584_v60 = vpop.eup %1583  ;;  %v1131_v61 = vadd.f32 %v2067_v0, %v1108_v58  ;;  %v1087_v4 = vmul.f32 %v1582_v59, %v2019_v44 }
 0x567   :  { %v1132_v48 = vadd.f32 %v2067_v0, %v1109_v35  ;;  %v1088_v47 = vmul.f32 %v1584_v60, %v2011_v23 }
 0x568   :  { %1147 = vst.msk [vmem:[%s2185_s5 + $0x48] sm:$0xff] %vm38_vm0, %v1131_v61  ;;  %v1110_v41 = vmul.f32 %v2061_v25, %v1087_v4 }
 0x569   :  { %v1586_v63 = vpop.eup %1585  ;;  %1148 = vst.msk [vmem:[%s2185_s5 + $0x50] sm:$0xff] %vm38_vm0, %v1132_v48  ;;  %v1111_v52 = vmul.f32 %v2061_v25, %v1088_v47 }
 0x56a   :  { %v1588_v44 = vpop.eup %1587  ;;  %v1133_v53 = vadd.f32 %v2067_v0, %v1110_v41  ;;  %v1089_v23 = vmul.f32 %v1586_v63, %v2030_v62 }
 0x56b   :  { %v1134_v27 = vadd.f32 %v2067_v0, %v1111_v52  ;;  %v1090_v11 = vmul.f32 %v1588_v44, %v2022_v43 }
 0x56c   :  { %1149 = vst.msk [vmem:[%s2185_s5 + $0x58] sm:$0xff] %vm38_vm0, %v1133_v53  ;;  %v1112_v50 = vmul.f32 %v2061_v25, %v1089_v23 }
 0x56d   :  { %v1590_v30 = vpop.eup %1589  ;;  %1150 = vst.msk [vmem:[%s2185_s5 + $0x60] sm:$0xff] %vm38_vm0, %v1134_v27  ;;  %v1113_v31 = vmul.f32 %v2061_v25, %v1090_v11 }
 0x56e   :  { %v1135_v62 = vadd.f32 %v2067_v0, %v1112_v50  ;;  %v1091_v32 = vmul.f32 %v1590_v30, %v2039_v29 }
 0x56f   :  { %v1136_v43 = vadd.f32 %v2067_v0, %v1113_v31 }
 0x570   :  { %1151 = vst.msk [vmem:[%s2185_s5 + $0x68] sm:$0xff] %vm38_vm0, %v1135_v62  ;;  %v1114_v54 = vmul.f32 %v2061_v25, %v1091_v32 }
 0x571   :  { %1152 = vst.msk [vmem:[%s2185_s5 + $0x70] sm:$0xff] %vm38_vm0, %v1136_v43 }
 0x572   :  { %v1137_v2 = vadd.f32 %v2067_v0, %v1114_v54 }
 0x574   :  { %1153 = vst.msk [vmem:[%s2185_s5 + $0x78] sm:$0xff] %vm38_vm0, %v1137_v2 }
 0x575   :  { %1613 = dma.done.wait [#allocation3], 256  }
 0x576   :  { %1614 = vsyncadd [#allocation3], 4294967040 }
 0x577   :  { %1173 = vsyncpa [#allocation3], 1 }

</bundles_post_ra>
